<compile_context>
chip_gen: v7x
topology: tpu7x:2x2x1
jax: 0.10.0
libtpu: 0.0.40
codegen_flags: <defaults>
</compile_context>

<pallas_src>
import functools
from typing import NamedTuple

import jax
import jax.numpy as jnp
from jax.experimental import pallas as pl
from jax.experimental.pallas import tpu as pltpu

LN_EPS = 1e-5   # PyTorch nn.LayerNorm default
LANE = 128      # TPU lane width


def _round_up(x, m):
    return -(-x // m) * m


def _ln_relu(h, gamma, beta, n_true):
    """Fused LayerNorm + ReLU on a lane-padded activation.

    Padded lanes of `h`, `gamma`, `beta` are exactly zero, so sums over the
    padded width equal sums over the true features; divide by the true count.
    Single-pass variance (E[h^2] - mu^2) saves one elementwise pass over h.
    """
    inv_n = 1.0 / float(n_true)
    mu = jnp.sum(h, axis=-1, keepdims=True) * inv_n
    var = jnp.sum(h * h, axis=-1, keepdims=True) * inv_n - mu * mu
    s = gamma * jax.lax.rsqrt(var + LN_EPS)   # per-row scale * per-feature gamma
    b = beta - mu * s                         # folded shift (0 on padded lanes)
    return jnp.maximum(h * s + b, 0.0)


def actor_kernel(x_ref,
                 w1_ref, p1_ref,      # p1 = [bias1; gamma1; beta1]  (3, fc1_pad) f32
                 w2_ref, p2_ref,      # p2 = [bias2; gamma2; beta2]  (3, fc2_pad) f32
                 w3_ref, b3_ref,      # mu weights lane-padded to 128 out lanes
                 o_ref,               # (tb, n_actions) -- narrow, live lanes only
                 *, n_feat1, n_feat2):
    io_dt = w1_ref.dtype   # matmul input dtype (bf16 or f32); accumulation is f32

    # fc1 -> LayerNorm -> ReLU
    h = jnp.dot(x_ref[...], w1_ref[...], preferred_element_type=jnp.float32)
    h = h + p1_ref[0:1, :]
    h = _ln_relu(h, p1_ref[1:2, :], p1_ref[2:3, :], n_feat1)

    # fc2 -> LayerNorm -> ReLU
    h = jnp.dot(h.astype(io_dt), w2_ref[...], preferred_element_type=jnp.float32)
    h = h + p2_ref[0:1, :]
    h = _ln_relu(h, p2_ref[1:2, :], p2_ref[2:3, :], n_feat2)

    # mu -> tanh: lane-dense 128-wide matmul in VMEM, but only the live
    # n_actions lanes get the bias/tanh and are stored to HBM.
    h = jnp.dot(h.astype(io_dt), w3_ref[...], preferred_element_type=jnp.float32)
    na = o_ref.shape[-1]
    h = h[:, :na] + b3_ref[0:1, :na]
    o_ref[...] = jnp.tanh(h).astype(o_ref.dtype)


class PackedActor(NamedTuple):
    w1: jax.Array
    p1: jax.Array
    w2: jax.Array
    p2: jax.Array
    w3: jax.Array
    b3: jax.Array
    fc1: int
    fc2: int
    n_actions: int


def actor_forward(x, packed: PackedActor, *, block_batch=None):
    """Run the fused actor forward.  `packed` comes from pack_params()."""
    batch, input_dim = x.shape
    n_actions = packed.n_actions
    io_dt = packed.w1.dtype
    if x.dtype != io_dt:
        # Ideally the caller already supplies x in the weights' dtype; this cast
        # is a fallback so the kernel's matmul inputs match.
        x = x.astype(io_dt)

    # Batch tile: large (amortizes per-grid-step overhead; ~85% of HBM roofline
    # at >=512-row tiles), multiple of 8 sublanes, clamped so the grid has >=2
    # steps when the batch allows it (v7x: shard "parallel" axis over 2 TCs).
    # Per-step VMEM at tb=2048 is only a few MB -- far under the scoped default
    # on all generations, so no vmem_limit_bytes override is needed here.
    if block_batch is None:
        block_batch = 2048
    tb = min(int(block_batch), _round_up(pl.cdiv(batch, 2), 8))
    tb = max(8, _round_up(tb, 8))
    grid = (pl.cdiv(batch, tb),)   # ragged final block handled by Pallas

    vmem = pltpu.MemorySpace.VMEM

    def const_map(i):
        return (0, 0)

    in_specs = [
        pl.BlockSpec((tb, input_dim), lambda i: (i, 0), memory_space=vmem),  # x tiled over batch
        pl.BlockSpec(packed.w1.shape, const_map, memory_space=vmem),         # params: VMEM-resident
        pl.BlockSpec(packed.p1.shape, const_map, memory_space=vmem),
        pl.BlockSpec(packed.w2.shape, const_map, memory_space=vmem),
        pl.BlockSpec(packed.p2.shape, const_map, memory_space=vmem),
        pl.BlockSpec(packed.w3.shape, const_map, memory_space=vmem),
        pl.BlockSpec(packed.b3.shape, const_map, memory_space=vmem),
    ]
    # Narrow output: last dim == full array dim (legal), only live lanes hit HBM.
    out_specs = pl.BlockSpec((tb, n_actions), lambda i: (i, 0), memory_space=vmem)

    f1p = packed.w1.shape[1]
    f2p = packed.w2.shape[1]
    outp = packed.w3.shape[1]
    param_bytes = sum(int(a.size) * a.dtype.itemsize
                      for a in (packed.w1, packed.p1, packed.w2, packed.p2,
                                packed.w3, packed.b3))
    flops = 2 * batch * (input_dim * f1p + f1p * f2p + f2p * outp)
    transcendentals = batch * (n_actions + 2)          # tanh on live lanes + 2 rsqrt/row
    bytes_accessed = (batch * input_dim * x.dtype.itemsize
                      + batch * n_actions * 4
                      + param_bytes)

    kernel = functools.partial(actor_kernel, n_feat1=packed.fc1, n_feat2=packed.fc2)

    out = pl.pallas_call(
        kernel,
        grid=grid,
        in_specs=in_specs,
        out_specs=out_specs,
        out_shape=jax.ShapeDtypeStruct((batch, n_actions), jnp.float32),
        compiler_params=pltpu.CompilerParams(
            dimension_semantics=("parallel",)),
        cost_estimate=pl.CostEstimate(
            flops=flops,
            transcendentals=transcendentals,
            bytes_accessed=bytes_accessed),
    )(x, packed.w1, packed.p1, packed.w2, packed.p2, packed.w3, packed.b3)

    return out


def init_params(key, input_dim, fc1_dims, fc2_dims, n_actions):
    """Deterministic init matching ActorNetwork.__init__ semantics.

    PyTorch fan values: f1 = 1/sqrt(fc1.weight.size(0)) = 1/sqrt(fc1_dims),
    f2 = 1/sqrt(fc2_dims), f3 = 0.003.  Weights stored as (in, out)
    (transposed relative to PyTorch's (out, in)).
    """
    k = jax.random.split(key, 6)
    f1 = 1.0 / jnp.sqrt(float(fc1_dims))
    f2 = 1.0 / jnp.sqrt(float(fc2_dims))
    f3 = 0.003

    w1 = jax.random.uniform(k[0], (input_dim, fc1_dims), jnp.float32, -f1, f1)
    b1 = jax.random.uniform(k[1], (1, fc1_dims), jnp.float32, -f1, f1)
    g1 = jnp.ones((1, fc1_dims), jnp.float32)       # LayerNorm weight
    be1 = jnp.zeros((1, fc1_dims), jnp.float32)     # LayerNorm bias

    w2 = jax.random.uniform(k[2], (fc1_dims, fc2_dims), jnp.float32, -f2, f2)
    b2 = jax.random.uniform(k[3], (1, fc2_dims), jnp.float32, -f2, f2)
    g2 = jnp.ones((1, fc2_dims), jnp.float32)
    be2 = jnp.zeros((1, fc2_dims), jnp.float32)

    w3 = jax.random.uniform(k[4], (fc2_dims, n_actions), jnp.float32, -f3, f3)
    b3 = jax.random.uniform(k[5], (1, n_actions), jnp.float32, -f3, f3)

    return (w1, b1, g1, be1, w2, b2, g2, be2, w3, b3)


def pack_params(params, dtype=jnp.bfloat16):
    """Pack 10 tensors into 6 kernel inputs.

    Hidden dims are zero-padded to the 128-lane width (lane-dense tiles; padded
    lanes stay exactly zero through LN/ReLU because gamma/beta/bias are padded
    with zeros).  The mu layer's output lanes are padded to 128 for a lane-dense
    MXU tile, but only the live lanes are ever stored.  Matmul weights are cast
    to `dtype` (bf16 by default -> halved HBM traffic; MXU-native on v5e/v6e/v7x);
    bias/gamma/beta stay f32 so the LayerNorm math is exact.
    """
    (w1, b1, g1, be1, w2, b2, g2, be2, w3, b3) = params
    fc1 = w1.shape[1]
    fc2 = w2.shape[1]
    n_actions = w3.shape[1]
    f1p = _round_up(max(fc1, LANE), LANE)
    f2p = _round_up(max(fc2, LANE), LANE)
    outp = _round_up(max(n_actions, LANE), LANE)

    w1p = jnp.pad(w1, ((0, 0), (0, f1p - fc1))).astype(dtype)
    p1 = jnp.pad(jnp.concatenate([b1, g1, be1], axis=0),
                 ((0, 0), (0, f1p - fc1))).astype(jnp.float32)       # (3, f1p)
    w2p = jnp.pad(w2, ((0, f1p - fc1), (0, f2p - fc2))).astype(dtype)
    p2 = jnp.pad(jnp.concatenate([b2, g2, be2], axis=0),
                 ((0, 0), (0, f2p - fc2))).astype(jnp.float32)       # (3, f2p)
    w3p = jnp.pad(w3, ((0, f2p - fc2), (0, outp - n_actions))).astype(dtype)
    b3p = jnp.pad(b3, ((0, 0), (0, outp - n_actions))).astype(jnp.float32)

    return PackedActor(w1=w1p, p1=p1, w2=w2p, p2=p2, w3=w3p, b3=b3p,
                       fc1=fc1, fc2=fc2, n_actions=n_actions)


def actor_ref(x, params):
    """Pure-JAX reference (unfused, unpadded) for correctness checking."""
    (w1, b1, g1, be1, w2, b2, g2, be2, w3, b3) = params

    def ln(h, gamma, beta):
        mu = jnp.mean(h, axis=-1, keepdims=True)
        var = jnp.mean((h - mu) * (h - mu), axis=-1, keepdims=True)
        return (h - mu) * jax.lax.rsqrt(var + LN_EPS) * gamma + beta

    h = x @ w1 + b1
    h = jnp.maximum(ln(h, g1, be1), 0.0)
    h = h @ w2 + b2
    h = jnp.maximum(ln(h, g2, be2), 0.0)
    return jnp.tanh(h @ w3 + b3)


if __name__ == "__main__":
    batch = 8
    input_dim = 16       # input_dims = (16,)
    fc1_dims = 64
    fc2_dims = 32
    n_actions = 4

    key = jax.random.PRNGKey(0)
    kx, kp = jax.random.split(key)
    x = jax.random.normal(kx, (batch, input_dim), dtype=jnp.float32)
    params = init_params(kp, input_dim, fc1_dims, fc2_dims, n_actions)
    ref = actor_ref(x, params)

    # f32 I/O path: tight check against the pure-JAX reference.
    packed_f32 = pack_params(params, dtype=jnp.float32)
    out = jax.block_until_ready(actor_forward(x, packed_f32))
    assert out.shape == (batch, n_actions)
    assert jnp.allclose(out, ref, atol=1e-4, rtol=1e-4), "mismatch vs reference (f32)"

    # bf16 I/O path (default packing): halved HBM traffic for x / weights,
    # f32 accumulation + f32 LN/tanh inside the kernel.
    packed_bf16 = pack_params(params)
    out_bf = jax.block_until_ready(actor_forward(x, packed_bf16))
    assert out_bf.shape == (batch, n_actions)
    assert jnp.allclose(out_bf, ref, atol=5e-3, rtol=0.0), "mismatch vs reference (bf16)"

    # Ragged batch + multi-step (pipelined) grid, no wrapper-side pad/slice.
    x2 = jax.random.normal(jax.random.PRNGKey(1), (37, input_dim), dtype=jnp.float32)
    ref2 = actor_ref(x2, params)
    out2 = jax.block_until_ready(actor_forward(x2, packed_f32, block_batch=16))
    assert out2.shape == (37, n_actions)
    assert jnp.allclose(out2, ref2, atol=1e-4, rtol=1e-4), "mismatch vs reference (ragged grid)"

    print("KERNEL_OK")
</pallas_src>

<mosaic_0001>
module attributes {stable_mosaic.version = 11 : i64} {
  func.func @actor_kernel(%arg0: i32, %arg1: memref<8x16xf32, #tpu.memory_space<vmem>>, %arg2: memref<16x128xf32, #tpu.memory_space<vmem>>, %arg3: memref<3x128xf32, #tpu.memory_space<vmem>>, %arg4: memref<128x128xf32, #tpu.memory_space<vmem>>, %arg5: memref<3x128xf32, #tpu.memory_space<vmem>>, %arg6: memref<128x128xf32, #tpu.memory_space<vmem>>, %arg7: memref<1x128xf32, #tpu.memory_space<vmem>>, %arg8: memref<8x4xf32, #tpu.memory_space<vmem>>) attributes {dimension_semantics = [#tpu.dimension_semantics<parallel>], iteration_bounds = array<i64: 1>, scalar_prefetch = 0 : i64, scratch_operands = 0 : i64, tpu.core_type = #tpu.core_type<tc>, window_params = [{transform_indices = @transform_0, window_bounds = array<i64: 8, 16>}, {pipeline_mode = #tpu.pipeline_mode<synchronous>, transform_indices = @transform_1, window_bounds = array<i64: 16, 128>}, {pipeline_mode = #tpu.pipeline_mode<synchronous>, transform_indices = @transform_2, window_bounds = array<i64: 3, 128>}, {pipeline_mode = #tpu.pipeline_mode<synchronous>, transform_indices = @transform_3, window_bounds = array<i64: 128, 128>}, {pipeline_mode = #tpu.pipeline_mode<synchronous>, transform_indices = @transform_4, window_bounds = array<i64: 3, 128>}, {pipeline_mode = #tpu.pipeline_mode<synchronous>, transform_indices = @transform_5, window_bounds = array<i64: 128, 128>}, {pipeline_mode = #tpu.pipeline_mode<synchronous>, transform_indices = @transform_6, window_bounds = array<i64: 1, 128>}, {transform_indices = @transform_7, window_bounds = array<i64: 8, 4>}]} {
    %c0 = arith.constant 0 : index
    %c0_0 = arith.constant 0 : index
    %0 = vector.load %arg1[%c0, %c0_0] : memref<8x16xf32, #tpu.memory_space<vmem>>, vector<8x16xf32>
    %c0_1 = arith.constant 0 : index
    %c0_2 = arith.constant 0 : index
    %1 = vector.load %arg2[%c0_1, %c0_2] : memref<16x128xf32, #tpu.memory_space<vmem>>, vector<16x128xf32>
    %cst = arith.constant dense<0.000000e+00> : vector<8x128xf32>
    %2 = tpu.matmul %0, %1, %cst {dimension_numbers = #tpu.dot_dimension_numbers<[1], [0], [0], [1], [0, 0, 1, 1], [], []>} : vector<8x16xf32>, vector<16x128xf32>, vector<8x128xf32> -> vector<8x128xf32>
    %c0_3 = arith.constant 0 : index
    %c0_4 = arith.constant 0 : index
    %3 = vector.load %arg3[%c0_3, %c0_4] : memref<3x128xf32, #tpu.memory_space<vmem>>, vector<1x128xf32>
    %4 = vector.broadcast %3 : vector<1x128xf32> to vector<8x128xf32>
    %5 = arith.addf %2, %4 : vector<8x128xf32>
    %c1 = arith.constant 1 : index
    %c0_5 = arith.constant 0 : index
    %6 = vector.load %arg3[%c1, %c0_5] : memref<3x128xf32, #tpu.memory_space<vmem>>, vector<1x128xf32>
    %c2 = arith.constant 2 : index
    %c0_6 = arith.constant 0 : index
    %7 = vector.load %arg3[%c2, %c0_6] : memref<3x128xf32, #tpu.memory_space<vmem>>, vector<1x128xf32>
    %cst_7 = arith.constant dense<0.000000e+00> : vector<8xf32>
    %8 = vector.multi_reduction <add>, %5, %cst_7 [1] : vector<8x128xf32> to vector<8xf32>
    %9 = vector.shape_cast %8 : vector<8xf32> to vector<8x1xf32>
    %cst_8 = arith.constant 1.562500e-02 : f32
    %10 = vector.broadcast %cst_8 : f32 to vector<8x1xf32>
    %11 = arith.mulf %9, %10 : vector<8x1xf32>
    %12 = arith.mulf %5, %5 : vector<8x128xf32>
    %cst_9 = arith.constant dense<0.000000e+00> : vector<8xf32>
    %13 = vector.multi_reduction <add>, %12, %cst_9 [1] : vector<8x128xf32> to vector<8xf32>
    %14 = vector.shape_cast %13 : vector<8xf32> to vector<8x1xf32>
    %cst_10 = arith.constant 1.562500e-02 : f32
    %15 = vector.broadcast %cst_10 : f32 to vector<8x1xf32>
    %16 = arith.mulf %14, %15 : vector<8x1xf32>
    %17 = arith.mulf %11, %11 : vector<8x1xf32>
    %18 = arith.subf %16, %17 : vector<8x1xf32>
    %cst_11 = arith.constant 9.99999974E-6 : f32
    %19 = vector.broadcast %cst_11 : f32 to vector<8x1xf32>
    %20 = arith.addf %18, %19 : vector<8x1xf32>
    %21 = math.rsqrt %20 : vector<8x1xf32>
    %22 = vector.broadcast %6 : vector<1x128xf32> to vector<8x128xf32>
    %23 = vector.broadcast %21 : vector<8x1xf32> to vector<8x128xf32>
    %24 = arith.mulf %22, %23 : vector<8x128xf32>
    %25 = vector.broadcast %11 : vector<8x1xf32> to vector<8x128xf32>
    %26 = arith.mulf %25, %24 : vector<8x128xf32>
    %27 = vector.broadcast %7 : vector<1x128xf32> to vector<8x128xf32>
    %28 = arith.subf %27, %26 : vector<8x128xf32>
    %29 = arith.mulf %5, %24 : vector<8x128xf32>
    %30 = arith.addf %29, %28 : vector<8x128xf32>
    %cst_12 = arith.constant 0.000000e+00 : f32
    %31 = vector.broadcast %cst_12 : f32 to vector<8x128xf32>
    %32 = arith.maximumf %30, %31 : vector<8x128xf32>
    %c0_13 = arith.constant 0 : index
    %c0_14 = arith.constant 0 : index
    %33 = vector.load %arg4[%c0_13, %c0_14] : memref<128x128xf32, #tpu.memory_space<vmem>>, vector<128x128xf32>
    %cst_15 = arith.constant dense<0.000000e+00> : vector<8x128xf32>
    %34 = tpu.matmul %32, %33, %cst_15 {dimension_numbers = #tpu.dot_dimension_numbers<[1], [0], [0], [1], [0, 0, 1, 1], [], []>} : vector<8x128xf32>, vector<128x128xf32>, vector<8x128xf32> -> vector<8x128xf32>
    %c0_16 = arith.constant 0 : index
    %c0_17 = arith.constant 0 : index
    %35 = vector.load %arg5[%c0_16, %c0_17] : memref<3x128xf32, #tpu.memory_space<vmem>>, vector<1x128xf32>
    %36 = vector.broadcast %35 : vector<1x128xf32> to vector<8x128xf32>
    %37 = arith.addf %34, %36 : vector<8x128xf32>
    %c1_18 = arith.constant 1 : index
    %c0_19 = arith.constant 0 : index
    %38 = vector.load %arg5[%c1_18, %c0_19] : memref<3x128xf32, #tpu.memory_space<vmem>>, vector<1x128xf32>
    %c2_20 = arith.constant 2 : index
    %c0_21 = arith.constant 0 : index
    %39 = vector.load %arg5[%c2_20, %c0_21] : memref<3x128xf32, #tpu.memory_space<vmem>>, vector<1x128xf32>
    %cst_22 = arith.constant dense<0.000000e+00> : vector<8xf32>
    %40 = vector.multi_reduction <add>, %37, %cst_22 [1] : vector<8x128xf32> to vector<8xf32>
    %41 = vector.shape_cast %40 : vector<8xf32> to vector<8x1xf32>
    %cst_23 = arith.constant 3.125000e-02 : f32
    %42 = vector.broadcast %cst_23 : f32 to vector<8x1xf32>
    %43 = arith.mulf %41, %42 : vector<8x1xf32>
    %44 = arith.mulf %37, %37 : vector<8x128xf32>
    %cst_24 = arith.constant dense<0.000000e+00> : vector<8xf32>
    %45 = vector.multi_reduction <add>, %44, %cst_24 [1] : vector<8x128xf32> to vector<8xf32>
    %46 = vector.shape_cast %45 : vector<8xf32> to vector<8x1xf32>
    %cst_25 = arith.constant 3.125000e-02 : f32
    %47 = vector.broadcast %cst_25 : f32 to vector<8x1xf32>
    %48 = arith.mulf %46, %47 : vector<8x1xf32>
    %49 = arith.mulf %43, %43 : vector<8x1xf32>
    %50 = arith.subf %48, %49 : vector<8x1xf32>
    %cst_26 = arith.constant 9.99999974E-6 : f32
    %51 = vector.broadcast %cst_26 : f32 to vector<8x1xf32>
    %52 = arith.addf %50, %51 : vector<8x1xf32>
    %53 = math.rsqrt %52 : vector<8x1xf32>
    %54 = vector.broadcast %38 : vector<1x128xf32> to vector<8x128xf32>
    %55 = vector.broadcast %53 : vector<8x1xf32> to vector<8x128xf32>
    %56 = arith.mulf %54, %55 : vector<8x128xf32>
    %57 = vector.broadcast %43 : vector<8x1xf32> to vector<8x128xf32>
    %58 = arith.mulf %57, %56 : vector<8x128xf32>
    %59 = vector.broadcast %39 : vector<1x128xf32> to vector<8x128xf32>
    %60 = arith.subf %59, %58 : vector<8x128xf32>
    %61 = arith.mulf %37, %56 : vector<8x128xf32>
    %62 = arith.addf %61, %60 : vector<8x128xf32>
    %cst_27 = arith.constant 0.000000e+00 : f32
    %63 = vector.broadcast %cst_27 : f32 to vector<8x128xf32>
    %64 = arith.maximumf %62, %63 : vector<8x128xf32>
    %c0_28 = arith.constant 0 : index
    %c0_29 = arith.constant 0 : index
    %65 = vector.load %arg6[%c0_28, %c0_29] : memref<128x128xf32, #tpu.memory_space<vmem>>, vector<128x128xf32>
    %cst_30 = arith.constant dense<0.000000e+00> : vector<8x128xf32>
    %66 = tpu.matmul %64, %65, %cst_30 {dimension_numbers = #tpu.dot_dimension_numbers<[1], [0], [0], [1], [0, 0, 1, 1], [], []>} : vector<8x128xf32>, vector<128x128xf32>, vector<8x128xf32> -> vector<8x128xf32>
    %67 = vector.extract_strided_slice %66 {offsets = [0, 0], sizes = [8, 4], strides = [1, 1]} : vector<8x128xf32> to vector<8x4xf32>
    %c0_31 = arith.constant 0 : index
    %c0_32 = arith.constant 0 : index
    %68 = vector.load %arg7[%c0_31, %c0_32] : memref<1x128xf32, #tpu.memory_space<vmem>>, vector<1x4xf32>
    %69 = vector.broadcast %68 : vector<1x4xf32> to vector<8x4xf32>
    %70 = arith.addf %67, %69 : vector<8x4xf32>
    %71 = math.tanh %70 : vector<8x4xf32>
    %c0_33 = arith.constant 0 : index
    %c0_34 = arith.constant 0 : index
    %72 = vector.load %arg8[%c0_33, %c0_34] : memref<8x4xf32, #tpu.memory_space<vmem>>, vector<8x4xf32>
    tpu.vector_store %arg8[%c0_33, %c0_34], %71 {strides = array<i32>} : memref<8x4xf32, #tpu.memory_space<vmem>>, vector<8x4xf32>,
    return
  }
  func.func @transform_0(%arg0: i32) -> (i32, i32) {
    %c0_i32 = arith.constant 0 : i32
    %c0_i32_0 = arith.constant 0 : i32
    return %arg0, %c0_i32 : i32, i32
  }
  func.func @transform_1(%arg0: i32) -> (i32, i32) {
    %c0_i32 = arith.constant 0 : i32
    %c0_i32_0 = arith.constant 0 : i32
    %c0_i32_1 = arith.constant 0 : i32
    return %c0_i32, %c0_i32_0 : i32, i32
  }
  func.func @transform_2(%arg0: i32) -> (i32, i32) {
    %c0_i32 = arith.constant 0 : i32
    %c0_i32_0 = arith.constant 0 : i32
    %c0_i32_1 = arith.constant 0 : i32
    return %c0_i32, %c0_i32_0 : i32, i32
  }
  func.func @transform_3(%arg0: i32) -> (i32, i32) {
    %c0_i32 = arith.constant 0 : i32
    %c0_i32_0 = arith.constant 0 : i32
    %c0_i32_1 = arith.constant 0 : i32
    return %c0_i32, %c0_i32_0 : i32, i32
  }
  func.func @transform_4(%arg0: i32) -> (i32, i32) {
    %c0_i32 = arith.constant 0 : i32
    %c0_i32_0 = arith.constant 0 : i32
    %c0_i32_1 = arith.constant 0 : i32
    return %c0_i32, %c0_i32_0 : i32, i32
  }
  func.func @transform_5(%arg0: i32) -> (i32, i32) {
    %c0_i32 = arith.constant 0 : i32
    %c0_i32_0 = arith.constant 0 : i32
    %c0_i32_1 = arith.constant 0 : i32
    return %c0_i32, %c0_i32_0 : i32, i32
  }
  func.func @transform_6(%arg0: i32) -> (i32, i32) {
    %c0_i32 = arith.constant 0 : i32
    %c0_i32_0 = arith.constant 0 : i32
    %c0_i32_1 = arith.constant 0 : i32
    return %c0_i32, %c0_i32_0 : i32, i32
  }
  func.func @transform_7(%arg0: i32) -> (i32, i32) {
    %c0_i32 = arith.constant 0 : i32
    %c0_i32_0 = arith.constant 0 : i32
    return %arg0, %c0_i32 : i32, i32
  }
}

</mosaic_0001>

<bundles_post_ra>
// kernel: tpu_custom_call.1
= control target key start
LH: loop header
LB: loop body
LE: loop exit
PB: predicated region body
PF: predicated region fallthrough
CT: control target
= control target key end

     0   :  { %12 = vsyncpa [#allocation3], 0  ;;  %s839_s0 = inlined_call_operand.hbm [shape: f32[8,16], index: 0, kind: input, shape index: {}]   ;;  %s840_s1 = inlined_call_operand.hbm [shape: f32[16,128], index: 1, kind: input, shape index: {}]   ;;  %s841_s2 = inlined_call_operand.vmem [shape: f32[3,128], index: 2, kind: input, shape index: {}]   ;;  %s842_s3 = inlined_call_operand.hbm [shape: f32[128,128], index: 3, kind: input, shape index: {}]   ;;  %s843_s4 = inlined_call_operand.vmem [shape: f32[3,128], index: 4, kind: input, shape index: {}]   ;;  %s844_s5 = inlined_call_operand.hbm [shape: f32[128,128], index: 5, kind: input, shape index: {}]   ;;  %s845_s6 = inlined_call_operand.vmem [shape: f32[1,128], index: 6, kind: input, shape index: {}]   ;;  %s846_s7 = inlined_call_operand.vmem [shape: f32[8,4], index: 7, kind: output, shape index: {}]  }
   0x1   :  { %13 = vsyncpa [#allocation5], 0 }
   0x2   :  { %14 = vsyncpa [#allocation8], 0  ;;  %s692_s24 = smov [#allocation4]   ;;  %s598_s28 = scalar_lea.hbm %s840_s1, 256 }
   0x3   :  { %s30_s25 = sshll.u32 %s692_s24, 4  ;;  %p599_p0 = scmp.ne.s32.totalorder %s840_s1, %s598_s28  ;;  %s31_s25 = int_to_ptr.vmem [resolvable:$true] %s30_s25 }
   0x4   :  { %p602_p1 = scmp.lt.u32.totalorder %s598_s28, %s840_s1 }
   0x6   :  { %p604_p2 = pnand %p602_p1, %p599_p0 }
   0x8   :  { %607 = shalt.err (!%p604_p2)
}
   0x9   :  { %s608_s10 = scalar_lea.vmem %s31_s25, 256  ;;  %p613_p4 = scmp.lt.s32.totalorder %s31_s25, %s31_s25 }
   0xa   :  { %p609_p3 = scmp.ne.s32.totalorder %s31_s25, %s608_s10  ;;  %p614_p5 = scmp.lt.s32.totalorder %s608_s10, %s608_s10 }
   0xc   :  { %p615_p6 = por %p614_p5, %p613_p4 }
   0xe   :  { %p616_p7 = pnand %p615_p6, %p609_p3 }
  0x10   :  { %619 = shalt.err (!%p616_p7)
}
  0x11   :  { %s693_s11 = smov 128   ;;  %s694_s12 = smov 8  }
  0x12   :  { %36 = dma.hbm_to_vmem [thread:$0]  %s840_s1, 256, %s31_s25, [#allocation5], %s693_s11, %s693_s11, %s694_s12  }
  0x13   :  { %s695_s15 = smov [#allocation2]   ;;  %s696_s17 = smov [#allocation6]  }
  0x14   :  { %s21_s16 = sshll.u32 %s695_s15, 4  ;;  %s44_s18 = sshll.u32 %s696_s17, 4  ;;  %s22_s16 = int_to_ptr.vmem [resolvable:$true] %s21_s16  ;;  %s45_s18 = int_to_ptr.vmem [resolvable:$true] %s44_s18 }
  0x15   :  { %s620_s21 = scalar_lea.hbm %s839_s0, 128 }
  0x16   :  { %p621_p8 = scmp.ne.s32.totalorder %s839_s0, %s620_s21  ;;  %p624_p9 = scmp.lt.u32.totalorder %s620_s21, %s839_s0 }
  0x18   :  { %p626_p10 = pnand %p624_p9, %p621_p8 }
  0x1a   :  { %629 = shalt.err (!%p626_p10)
}
  0x1b   :  { %s630_s1 = scalar_lea.vmem %s22_s16, 128  ;;  %p635_p12 = scmp.lt.s32.totalorder %s22_s16, %s22_s16 }
  0x1c   :  { %p631_p11 = scmp.ne.s32.totalorder %s22_s16, %s630_s1  ;;  %p636_p13 = scmp.lt.s32.totalorder %s630_s1, %s630_s1 }
  0x1e   :  { %p637_p0 = por %p636_p13, %p635_p12 }
  0x20   :  { %p638_p1 = pnand %p637_p0, %p631_p11 }
  0x22   :  { %641 = shalt.err (!%p638_p1)
}
  0x23   :  { %24 = dma.hbm_to_vmem [thread:$0]  %s839_s0, 128, %s22_s16, [#allocation3]  }
  0x24   :  { %s642_s30 = scalar_lea.hbm %s842_s3, 2048 }
  0x25   :  { %p643_p2 = scmp.ne.s32.totalorder %s842_s3, %s642_s30  ;;  %p646_p3 = scmp.lt.u32.totalorder %s642_s30, %s842_s3 }
  0x27   :  { %p648_p4 = pnand %p646_p3, %p643_p2 }
  0x29   :  { %651 = shalt.err (!%p648_p4)
}
  0x2a   :  { %s652_s14 = scalar_lea.vmem %s45_s18, 2048  ;;  %p657_p6 = scmp.lt.s32.totalorder %s45_s18, %s45_s18 }
  0x2b   :  { %p653_p5 = scmp.ne.s32.totalorder %s45_s18, %s652_s14  ;;  %p658_p7 = scmp.lt.s32.totalorder %s652_s14, %s652_s14 }
  0x2d   :  { %p659_p8 = por %p658_p7, %p657_p6 }
  0x2f   :  { %p660_p9 = pnand %p659_p8, %p653_p5 }
  0x31   :  { %663 = shalt.err (!%p660_p9)
}
  0x32   :  { %50 = dma.hbm_to_vmem [thread:$0]  %s842_s3, 2048, %s45_s18, [#allocation5], %s693_s11, %s693_s11, %s694_s12  }
  0x33   :  { %s697_s16 = smov [#allocation7]   ;;  %s664_s21 = scalar_lea.hbm %s844_s5, 2048 }
  0x34   :  { %s58_s17 = sshll.u32 %s697_s16, 4  ;;  %p665_p10 = scmp.ne.s32.totalorder %s844_s5, %s664_s21  ;;  %s59_s17 = int_to_ptr.vmem [resolvable:$true] %s58_s17 }
  0x35   :  { %p668_p11 = scmp.lt.u32.totalorder %s664_s21, %s844_s5 }
  0x37   :  { %p670_p12 = pnand %p668_p11, %p665_p10 }
  0x39   :  { %673 = shalt.err (!%p670_p12)
}
  0x3a   :  { %s674_s1 = scalar_lea.vmem %s59_s17, 2048  ;;  %p679_p0 = scmp.lt.s32.totalorder %s59_s17, %s59_s17 }
  0x3b   :  { %p675_p13 = scmp.ne.s32.totalorder %s59_s17, %s674_s1  ;;  %p680_p1 = scmp.lt.s32.totalorder %s674_s1, %s674_s1 }
  0x3d   :  { %p681_p2 = por %p680_p1, %p679_p0 }
  0x3f   :  { %p682_p3 = pnand %p681_p2, %p675_p13 }
  0x41   :  { %685 = shalt.err (!%p682_p3)
}
  0x42   :  { %64 = dma.hbm_to_vmem [thread:$0]  %s844_s5, 2048, %s59_s17, [#allocation8], %s693_s11, %s693_s11, %s694_s12  }
  0x43   :  { %686 = dma.done.wait [#allocation3], 128  }
  0x44   :  { %687 = vsyncadd [#allocation3], 4294967168 }
  0x45   :  { %688 = dma.done.wait [#allocation5], 2304  }
  0x46   :  { %689 = vsyncadd [#allocation5], 4294964992 }
  0x47   :  { %690 = dma.done.wait [#allocation8], 2048  }
  0x48   :  { %691 = vsyncadd [#allocation8], 4294965248  ;;  %v698_v0 = vmov 0.0|0.0   ;;  %vm699_vm0 = vmmov 0   ;;  %v700_v1 = vmov 0.0   ;;  %v80_v2 = vld [vmem:[#allocation4] sm:$0xff] }
  0x49   :  { %532 = vmatprep.subr.bf16.mxu0 %v698_v0  ;;  %459 = vmatprep.mubr.msk.f32.mxu0 %vm699_vm0, %v700_v1  ;;  %v81_v3 = vld [vmem:[#allocation4 + $0x8] sm:$0xff]  ;;  %v79_v5 = vld [vmem:[#allocation2] sm:$0xff]  ;;  %vm87_vm1 = vcmask 130048   ;;  %v188_v11 = vld [vmem:[#allocation6] sm:$0xff]  ;;  %vm401_vm2 = vcmask 31744  }
  0x4a   :  { %535 = vmatprep.subr.bf16.mxu1 %v698_v0  ;;  %494 = vmatprep.mubr.msk.f32.mxu1 %vm699_vm0, %v700_v1  ;;  %v533_v4 = vpack.c.bf16 %v81_v3, %v80_v2  ;;  %v410_v6 = vld [vmem:[%s841_s2] ss:$0 sm:$0xff]  ;;  %v190_v14 = vld [vmem:[#allocation6 + $0x10] sm:$0xff]  ;;  %v191_v15 = vld [vmem:[#allocation6 + $0x18] sm:$0xff] }
  0x4b   :  { %v189_v12 = vld [vmem:[#allocation6 + $0x8] sm:$0xff]  ;;  %v539_v16 = vpack.c.bf16 %v191_v15, %v190_v14  ;;  %v192_v17 = vld [vmem:[#allocation6 + $0x20] sm:$0xff]  ;;  %v194_v20 = vld [vmem:[#allocation6 + $0x30] sm:$0xff] }
  0x4c   :  { %534 = vmatpush3.bf16.msra.mxu0 %v533_v4  ;;  %v536_v13 = vpack.c.bf16 %v189_v12, %v188_v11  ;;  %v193_v18 = vld [vmem:[#allocation6 + $0x28] sm:$0xff]  ;;  %v195_v21 = vld [vmem:[#allocation6 + $0x38] sm:$0xff]  ;;  %v196_v23 = vld [vmem:[#allocation6 + $0x40] sm:$0xff] }
  0x4d   :  { %559 = vmatprep.subr.bf16.mxu0 %v698_v0  ;;  %v542_v19 = vpack.c.bf16 %v193_v18, %v192_v17  ;;  %v545_v22 = vpack.c.bf16 %v195_v21, %v194_v20  ;;  %v197_v24 = vld [vmem:[#allocation6 + $0x48] sm:$0xff]  ;;  %v198_v26 = vld [vmem:[#allocation6 + $0x50] sm:$0xff]  ;;  %v199_v27 = vld [vmem:[#allocation6 + $0x58] sm:$0xff] }
  0x4e   :  { %537 = vmatpush3.bf16.msra.mxu1 %v536_v13  ;;  %v548_v25 = vpack.c.bf16 %v197_v24, %v196_v23  ;;  %v551_v28 = vpack.c.bf16 %v199_v27, %v198_v26  ;;  %v200_v29 = vld [vmem:[#allocation6 + $0x60] sm:$0xff]  ;;  %v201_v30 = vld [vmem:[#allocation6 + $0x68] sm:$0xff]  ;;  %v202_v32 = vld [vmem:[#allocation6 + $0x70] sm:$0xff] }
  0x4f   :  { %460 = vmatmul.mubr.msk.f32.vlgmr.msra.gmra.mrb[0].mxu0 %vm87_vm1, %v79_v5  ;;  %538 = vmatprep.subr.bf16.mxu1 %v698_v0  ;;  %v554_v31 = vpack.c.bf16 %v201_v30, %v200_v29  ;;  %v203_v33 = vld [vmem:[#allocation6 + $0x78] sm:$0xff]  ;;  %v412_v42 = vld [vmem:[%s841_s2 + $0x1] ss:$0 sm:$0xff]  ;;  %v413_v45 = vld [vmem:[%s841_s2 + $0x2] ss:$0 sm:$0xff] }
  0x50   :  { %529 = vmatprep.mubr.msk.f32.mxu0 %vm699_vm0, %v700_v1  ;;  %v557_v34 = vpack.c.bf16 %v203_v33, %v202_v32  ;;  %v414_v51 = vld [vmem:[%s843_s4] ss:$0 sm:$0xff]  ;;  %v306_v56 = vld [vmem:[#allocation7] sm:$0xff]  ;;  %v308_v59 = vld [vmem:[#allocation7 + $0x10] sm:$0xff] }
  0x51   :  { %v307_v57 = vld [vmem:[#allocation7 + $0x8] sm:$0xff]  ;;  %v309_v60 = vld [vmem:[#allocation7 + $0x18] sm:$0xff]  ;;  %v310_v62 = vld [vmem:[#allocation7 + $0x20] sm:$0xff] }
  0x52   :  { %540 = vmatpush3.bf16.msra.mxu1 %v539_v16  ;;  %v560_v58 = vpack.c.bf16 %v307_v57, %v306_v56  ;;  %v563_v61 = vpack.c.bf16 %v309_v60, %v308_v59  ;;  %v311_v63 = vld [vmem:[#allocation7 + $0x28] sm:$0xff]  ;;  %v312_v2 = vld [vmem:[#allocation7 + $0x30] sm:$0xff]  ;;  %v313_v3 = vld [vmem:[#allocation7 + $0x38] sm:$0xff] }
  0x53   :  { %541 = vmatprep.subr.bf16.mxu1 %v698_v0  ;;  %v566_v1 = vpack.c.bf16 %v311_v63, %v310_v62  ;;  %v569_v4 = vpack.c.bf16 %v313_v3, %v312_v2  ;;  %v314_v5 = vld [vmem:[#allocation7 + $0x40] sm:$0xff]  ;;  %v319_v12 = vld [vmem:[#allocation7 + $0x68] sm:$0xff]  ;;  %v320_v14 = vld [vmem:[#allocation7 + $0x70] sm:$0xff] }
  0x54   :  { %561 = vmatpush3.bf16.msra.mxu0 %v560_v58  ;;  %v318_v11 = vld [vmem:[#allocation7 + $0x60] sm:$0xff]  ;;  %v321_v15 = vld [vmem:[#allocation7 + $0x78] sm:$0xff]  ;;  %v415_v24 = vld [vmem:[%s843_s4 + $0x1] ss:$0 sm:$0xff] }
  0x55   :  { %562 = vmatprep.subr.bf16.mxu0 %v698_v0  ;;  %v578_v13 = vpack.c.bf16 %v319_v12, %v318_v11  ;;  %v581_v16 = vpack.c.bf16 %v321_v15, %v320_v14  ;;  %v416_v27 = vld [vmem:[%s843_s4 + $0x2] ss:$0 sm:$0xff]  ;;  %v417_v32 = vld [vmem:[%s845_s6] ss:$0 sm:$0xff] }
  0x56   :  { %543 = vmatpush3.bf16.msra.mxu1 %v542_v19 }
  0x57   :  { %544 = vmatprep.subr.bf16.mxu1 %v698_v0 }
  0x58   :  { %564 = vmatpush3.bf16.msra.mxu0 %v563_v61 }
  0x59   :  { %565 = vmatprep.subr.bf16.mxu0 %v698_v0 }
  0x5a   :  { %546 = vmatpush3.bf16.msra.mxu1 %v545_v22 }
  0x5b   :  { %547 = vmatprep.subr.bf16.mxu1 %v698_v0 }
  0x5c   :  { %567 = vmatpush3.bf16.msra.mxu0 %v566_v1 }
  0x5d   :  { %568 = vmatprep.subr.bf16.mxu0 %v698_v0 }
  0x5e   :  { %549 = vmatpush3.bf16.msra.mxu1 %v548_v25 }
  0x5f   :  { %550 = vmatprep.subr.bf16.mxu1 %v698_v0 }
  0x60   :  { %570 = vmatpush3.bf16.msra.mxu0 %v569_v4 }
  0x61   :  { %571 = vmatprep.subr.bf16.mxu0 %v698_v0 }
  0x62   :  { %552 = vmatpush3.bf16.msra.mxu1 %v551_v28 }
  0x63   :  { %553 = vmatprep.subr.bf16.mxu1 %v698_v0 }
  0x66   :  { %555 = vmatpush3.bf16.msra.mxu1 %v554_v31 }
  0x67   :  { %556 = vmatprep.subr.bf16.mxu1 %v698_v0 }
  0x6a   :  { %558 = vmatpush3.bf16.msra.mxu1 %v557_v34 }
 0x122   :  { %v157_v7 = vpop.f32.mrb[0].mxu0 }
 0x123   :  { %v158_v8 = vadd.f32 %v410_v6, %v157_v7  ;;  %v461_v9 = vpop.f32.mrb[1].mxu0  ;;  %v315_v6 = vld [vmem:[#allocation7 + $0x48] sm:$0xff] }
 0x124   :  { %v572_v7 = vpack.c.bf16 %v315_v6, %v314_v5  ;;  %v317_v9 = vld [vmem:[#allocation7 + $0x58] sm:$0xff] }
 0x125   :  { %163 = vadd.xlane.f32.xlu0 %v158_v8  ;;  %v166_v10 = vmul.f32 %v158_v8, %v158_v8 }
 0x126   :  { %573 = vmatpush3.bf16.msra.mxu0 %v572_v7 }
 0x127   :  { %574 = vmatprep.subr.bf16.mxu0 %v698_v0 }
 0x129   :  { %167 = vadd.xlane.f32.xlu0 %v166_v10 }
 0x1b2   :  { %v164_v35 = vpop.xlane.xlu0 %163 }
 0x1b3   :  { %v165_v36 = vmul.f32 0.015625, %v164_v35 }
 0x1b5   :  { %v170_v38 = vmul.f32 %v165_v36, %v165_v36 }
 0x1b6   :  { %v168_v37 = vpop.xlane.xlu0 %167 }
 0x1b7   :  { %v169_v39 = vmul.f32 0.015625, %v168_v37 }
 0x1b9   :  { %v171_v40 = vsub.f32 %v169_v39, %v170_v38 }
 0x1bb   :  { %v172_v41 = vadd.f32 1e-05, %v171_v40 }
 0x1bd   :  { %592 = vrsqrt.f32 %v172_v41 }
 0x1c7   :  { %v593_v43 = vpop.eup %592 }
 0x1c8   :  { %v178_v44 = vmul.f32 %v593_v43, %v412_v42 }
 0x1ca   :  { %v179_v46 = vmul.f32 %v178_v44, %v165_v36  ;;  %v185_v48 = vmul.f32 %v178_v44, %v158_v8  ;;  %v316_v8 = vld [vmem:[#allocation7 + $0x50] sm:$0xff] }
 0x1cb   :  { %v575_v10 = vpack.c.bf16 %v317_v9, %v316_v8 }
 0x1cc   :  { %v184_v47 = vsub.f32 %v413_v45, %v179_v46 }
 0x1cd   :  { %576 = vmatpush3.bf16.msra.mxu0 %v575_v10 }
 0x1ce   :  { %v186_v49 = vadd.f32 %v185_v48, %v184_v47  ;;  %577 = vmatprep.subr.bf16.mxu0 %v698_v0 }
 0x1d0   :  { %v187_v50 = vmax.f32 %v186_v49, 0.0 }
 0x1d1   :  { %579 = vmatpush3.bf16.msra.mxu0 %v578_v13 }
 0x1d2   :  { %495 = vmatmul.mubr.f32.vlgmr.msra.gmra.mrb[0].mxu1 %v187_v50  ;;  %580 = vmatprep.subr.bf16.mxu0 %v698_v0 }
 0x1d5   :  { %582 = vmatpush3.bf16.msra.mxu0 %v581_v16 }
 0x2a5   :  { %v275_v52 = vpop.f32.mrb[0].mxu1 }
 0x2a6   :  { %v276_v53 = vadd.f32 %v414_v51, %v275_v52  ;;  %v496_v54 = vpop.f32.mrb[1].mxu1 }
 0x2a8   :  { %281 = vadd.xlane.f32.xlu1 %v276_v53  ;;  %v284_v55 = vmul.f32 %v276_v53, %v276_v53 }
 0x2ac   :  { %285 = vadd.xlane.f32.xlu1 %v284_v55 }
 0x335   :  { %v282_v17 = vpop.xlane.xlu1 %281 }
 0x336   :  { %v283_v18 = vmul.f32 0.03125, %v282_v17 }
 0x338   :  { %v288_v20 = vmul.f32 %v283_v18, %v283_v18 }
 0x339   :  { %v286_v19 = vpop.xlane.xlu1 %285 }
 0x33a   :  { %v287_v21 = vmul.f32 0.03125, %v286_v19 }
 0x33c   :  { %v289_v22 = vsub.f32 %v287_v21, %v288_v20 }
 0x33e   :  { %v290_v23 = vadd.f32 1e-05, %v289_v22 }
 0x340   :  { %594 = vrsqrt.f32 %v290_v23 }
 0x34a   :  { %v595_v25 = vpop.eup %594 }
 0x34b   :  { %v296_v26 = vmul.f32 %v595_v25, %v415_v24 }
 0x34d   :  { %v297_v0 = vmul.f32 %v296_v26, %v283_v18  ;;  %v303_v29 = vmul.f32 %v296_v26, %v276_v53 }
 0x34f   :  { %v302_v28 = vsub.f32 %v416_v27, %v297_v0 }
 0x351   :  { %v304_v30 = vadd.f32 %v303_v29, %v302_v28 }
 0x353   :  { %v305_v31 = vmax.f32 %v304_v30, 0.0 }
 0x355   :  { %530 = vmatmul.mubr.f32.vlgmr.msra.gmra.mrb[2].mxu0 %v305_v31 }
 0x428   :  { %v388_v33 = vpop.f32.mrb[2].mxu0 }
 0x429   :  { %v399_v34 = vadd.f32 %v417_v32, %v388_v33  ;;  %v531_v35 = vpop.f32.mrb[3].mxu0 }
 0x42b   :  { %596 = vtanh.f32 %v399_v34 }
 0x435   :  { %v597_v36 = vpop.eup %596 }
 0x436   :  { %402 = vst.msk [vmem:[%s846_s7] sm:$0xff] %vm401_vm2, %v597_v36 }
 0x437   :  { %407 = vsyncpa [#allocation3], 1 }
 0x438   :  { %408 = vsyncpa [#allocation5], 1 }
 0x439   :  { %409 = vsyncpa [#allocation8], 1 }

</bundles_post_ra>
